<compile_context>
chip_gen: v6e
topology: v6e:2x2x1
jax: 0.10.0
libtpu: 0.0.40
codegen_flags: <defaults>
</compile_context>

<pallas_src>
import jax
import jax.numpy as jnp
from jax.experimental import pallas as pl
from jax.experimental.pallas import tpu as pltpu


NUM_LABELS = 18
SMALL_BATCH_THRESHOLD = 256   # below this, plain XLA beats a custom-call launch


def _round_up(x, m):
    return ((x + m - 1) // m) * m


# ----------------------------------------------------------------------------
# Pallas kernel (one batch tile per grid step):
#   out = t @ W1 + p @ W2 + im @ W3 + (b1 + b2 + b3)
#   t  : [TM, 18]   title logits tile
#   p  : [TM, 18]   plot logits tile
#   im : [TM, 12]   image logits tile
#   W1 : [18, 18], W2 : [18, 18], W3 : [12, 18]  (resident, pre-transposed)
#   b  : [1, 18]    pre-summed bias
# ----------------------------------------------------------------------------
def fusion_kernel(t_ref, p_ref, im_ref, w1_ref, w2_ref, w3_ref, b_ref, o_ref):
    acc = jnp.dot(t_ref[...], w1_ref[...],
                  preferred_element_type=jnp.float32,
                  precision=jax.lax.Precision.HIGHEST)
    acc = acc + jnp.dot(p_ref[...], w2_ref[...],
                        preferred_element_type=jnp.float32,
                        precision=jax.lax.Precision.HIGHEST)
    acc = acc + jnp.dot(im_ref[...], w3_ref[...],
                        preferred_element_type=jnp.float32,
                        precision=jax.lax.Precision.HIGHEST)
    o_ref[...] = (acc + b_ref[...]).astype(o_ref.dtype)


def multimodal_fusion(title_logits, plot_logits, image_logits, params,
                      *, force_pallas=False, tm=None, act_dtype=None):
    """Pallas-backed equivalent of:
         fc1(title_logits) + fc2(plot_logits) + fc3(image_logits)
    """
    w1, b1 = params["fc1"]      # [18,18], [1,18]
    w2, b2 = params["fc2"]      # [18,18], [1,18]
    w3, b3 = params["fc3"]      # [12,18], [1,18]
    b_sum = (b1 + b2 + b3).astype(jnp.float32)   # pre-summed once

    B = title_logits.shape[0]
    N = w1.shape[1]

    # Small-batch fast path: the whole op is <100 KB of data; skip the custom
    # call and let XLA fuse the three tiny matmuls with their producers.
    if not force_pallas and B < SMALL_BATCH_THRESHOLD:
        return (title_logits @ w1 + plot_logits @ w2 + image_logits @ w3 + b_sum)

    if act_dtype is not None:   # optional bf16 serving path (halves HBM reads)
        title_logits = title_logits.astype(act_dtype)
        plot_logits = plot_logits.astype(act_dtype)
        image_logits = image_logits.astype(act_dtype)
        w1 = w1.astype(act_dtype)
        w2 = w2.astype(act_dtype)
        w3 = w3.astype(act_dtype)

    # Batch-tile selection: multiple of 8 (or == B for tiny forced batches),
    # large enough to amortize per-step overhead, and guaranteeing >=2 grid
    # steps when possible so v7x can shard the "parallel" axis across its 2 TCs.
    if tm is None:
        if B <= 8:
            tm = B
        else:
            tm = min(1024, _round_up(pl.cdiv(B, 2), 8))
    grid = (pl.cdiv(B, tm),)   # ragged last block is masked by Pallas; no padding

    out = pl.pallas_call(
        fusion_kernel,
        out_shape=jax.ShapeDtypeStruct((B, N), jnp.float32),
        grid=grid,
        in_specs=[
            pl.BlockSpec((tm, title_logits.shape[1]), lambda i: (i, 0)),  # title tile
            pl.BlockSpec((tm, plot_logits.shape[1]),  lambda i: (i, 0)),  # plot tile
            pl.BlockSpec((tm, image_logits.shape[1]), lambda i: (i, 0)),  # image tile
            pl.BlockSpec(w1.shape,    lambda i: (0, 0)),                  # resident W1
            pl.BlockSpec(w2.shape,    lambda i: (0, 0)),                  # resident W2
            pl.BlockSpec(w3.shape,    lambda i: (0, 0)),                  # resident W3
            pl.BlockSpec(b_sum.shape, lambda i: (0, 0)),                  # resident bias
        ],
        out_specs=pl.BlockSpec((tm, N), lambda i: (i, 0)),
        compiler_params=pltpu.CompilerParams(
            dimension_semantics=("parallel",)),
    )(title_logits, plot_logits, image_logits, w1, w2, w3, b_sum)
    return out


# ----------------------------------------------------------------------------
# Deterministic stand-in backbones (plain JAX glue).
# TODO(synk): the pretrained DistilBERT / plot-classifier / T2T-ViT-14 backbones
#             have no clean in-script Pallas equivalent; replaced by tiny
#             deterministic encoders producing logits of the same shapes.
# ----------------------------------------------------------------------------
def text_stub_logits(input_ids, attention_mask, embed, head_w, head_b):
    emb = jnp.take(embed, input_ids, axis=0)                      # [B, S, H]
    mask = attention_mask[..., None].astype(jnp.float32)          # [B, S, 1]
    pooled = (emb * mask).sum(axis=1) / jnp.maximum(mask.sum(axis=1), 1.0)
    return pooled @ head_w + head_b                               # [B, num_labels]


def image_stub_logits(image_nchw, head_w, head_b):
    B = image_nchw.shape[0]
    flat = image_nchw.reshape(B, -1)                              # [B, C*H*W]
    return flat @ head_w + head_b                                 # [B, 12]


# ----------------------------------------------------------------------------
# Parameter init (deterministic, mimics torch.nn.Linear's U(-1/sqrt(in), 1/sqrt(in)))
# ----------------------------------------------------------------------------
def init_linear(key, in_f, out_f):
    kw, kb = jax.random.split(key)
    bound = 1.0 / jnp.sqrt(in_f)
    # stored as [in, out] (pre-transposed from PyTorch's [out, in])
    w = jax.random.uniform(kw, (in_f, out_f), jnp.float32, -bound, bound)
    b = jax.random.uniform(kb, (1, out_f), jnp.float32, -bound, bound)
    return w, b


if __name__ == "__main__":
    key = jax.random.PRNGKey(0)
    (k_fc1, k_fc2, k_fc3, k_emb1, k_h1, k_emb2, k_h2, k_h3,
     k_ids1, k_ids2, k_img) = jax.random.split(key, 11)

    # small synthetic shapes
    B, S, VOCAB, H = 2, 8, 64, 32
    C, IH, IW = 3, 16, 16

    # fusion-head params (the module's own fc1/fc2/fc3)
    params = {
        "fc1": init_linear(k_fc1, 18, NUM_LABELS),
        "fc2": init_linear(k_fc2, 18, NUM_LABELS),
        "fc3": init_linear(k_fc3, 12, NUM_LABELS),
    }

    # stand-in backbone params
    embed1 = jax.random.normal(k_emb1, (VOCAB, H), jnp.float32) * 0.02
    head1_w = jax.random.normal(k_h1, (H, 18), jnp.float32) * 0.1
    head1_b = jnp.zeros((18,), jnp.float32)
    embed2 = jax.random.normal(k_emb2, (VOCAB, H), jnp.float32) * 0.02
    head2_w = jax.random.normal(k_h2, (H, 18), jnp.float32) * 0.1
    head2_b = jnp.zeros((18,), jnp.float32)
    head3_w = jax.random.normal(k_h3, (C * IH * IW, 12), jnp.float32) * 0.02
    head3_b = jnp.zeros((12,), jnp.float32)

    # example inputs (matching the PyTorch forward signature)
    title_input_ids = jax.random.randint(k_ids1, (B, S), 0, VOCAB)
    title_attention_mask = jnp.ones((B, S), jnp.int32)
    plot_input_ids = jax.random.randint(k_ids2, (B, S), 0, VOCAB)
    plot_attention_mask = jnp.ones((B, S), jnp.int32)
    image_input = jax.random.normal(k_img, (B, C, IH, IW), jnp.float32)  # NCHW

    # backbone stubs (plain JAX glue)
    title_logits = text_stub_logits(title_input_ids, title_attention_mask,
                                    embed1, head1_w, head1_b)          # [B, 18]
    plot_logits = text_stub_logits(plot_input_ids, plot_attention_mask,
                                   embed2, head2_w, head2_b)           # [B, 18]
    image_logits = image_stub_logits(image_input, head3_w, head3_b)    # [B, 12]

    # reference: the ORIGINAL three-Linear formulation
    def reference(t, p, im):
        return (jnp.dot(t, params["fc1"][0], precision="highest") + params["fc1"][1]
                + jnp.dot(p, params["fc2"][0], precision="highest") + params["fc2"][1]
                + jnp.dot(im, params["fc3"][0], precision="highest") + params["fc3"][1])

    # 1) Pallas path at the demo batch (forced, single full-batch block)
    out = multimodal_fusion(title_logits, plot_logits, image_logits, params,
                            force_pallas=True)
    out = jax.block_until_ready(out)
    ref = reference(title_logits, plot_logits, image_logits)
    assert out.shape == (B, NUM_LABELS)
    assert jnp.allclose(out, ref, atol=1e-4, rtol=1e-4)

    # 2) small-batch XLA fast path (default dispatch at B=2)
    out_fast = multimodal_fusion(title_logits, plot_logits, image_logits, params)
    assert jnp.allclose(jax.block_until_ready(out_fast), ref, atol=1e-4, rtol=1e-4)

    # 3) larger batch: exercises the tiled Pallas path with >=2 grid steps and a
    #    ragged (masked) last block, no padding copies.
    Bl = 300
    kt, kp, ki = jax.random.split(jax.random.PRNGKey(1), 3)
    t_big = jax.random.normal(kt, (Bl, 18), jnp.float32)
    p_big = jax.random.normal(kp, (Bl, 18), jnp.float32)
    i_big = jax.random.normal(ki, (Bl, 12), jnp.float32)
    out_big = jax.block_until_ready(
        multimodal_fusion(t_big, p_big, i_big, params))
    ref_big = reference(t_big, p_big, i_big)
    assert out_big.shape == (Bl, NUM_LABELS)
    assert jnp.allclose(out_big, ref_big, atol=1e-4, rtol=1e-4)

    print("KERNEL_OK")
</pallas_src>

<mosaic_0001>
module attributes {stable_mosaic.version = 11 : i64} {
  func.func @fusion_kernel(%arg0: i32, %arg1: memref<2x18xf32, #tpu.memory_space<vmem>>, %arg2: memref<2x18xf32, #tpu.memory_space<vmem>>, %arg3: memref<2x12xf32, #tpu.memory_space<vmem>>, %arg4: memref<18x18xf32, #tpu.memory_space<vmem>>, %arg5: memref<18x18xf32, #tpu.memory_space<vmem>>, %arg6: memref<12x18xf32, #tpu.memory_space<vmem>>, %arg7: memref<1x18xf32, #tpu.memory_space<vmem>>, %arg8: memref<2x18xf32, #tpu.memory_space<vmem>>) attributes {dimension_semantics = [#tpu.dimension_semantics<parallel>], iteration_bounds = array<i64: 1>, scalar_prefetch = 0 : i64, scratch_operands = 0 : i64, tpu.core_type = #tpu.core_type<tc>, window_params = [{transform_indices = @transform_0, window_bounds = array<i64: 2, 18>}, {transform_indices = @transform_1, window_bounds = array<i64: 2, 18>}, {transform_indices = @transform_2, window_bounds = array<i64: 2, 12>}, {pipeline_mode = #tpu.pipeline_mode<synchronous>, transform_indices = @transform_3, window_bounds = array<i64: 18, 18>}, {pipeline_mode = #tpu.pipeline_mode<synchronous>, transform_indices = @transform_4, window_bounds = array<i64: 18, 18>}, {pipeline_mode = #tpu.pipeline_mode<synchronous>, transform_indices = @transform_5, window_bounds = array<i64: 12, 18>}, {pipeline_mode = #tpu.pipeline_mode<synchronous>, transform_indices = @transform_6, window_bounds = array<i64: 1, 18>}, {transform_indices = @transform_7, window_bounds = array<i64: 2, 18>}]} {
    %c0 = arith.constant 0 : index
    %c0_0 = arith.constant 0 : index
    %0 = vector.load %arg1[%c0, %c0_0] : memref<2x18xf32, #tpu.memory_space<vmem>>, vector<2x18xf32>
    %c0_1 = arith.constant 0 : index
    %c0_2 = arith.constant 0 : index
    %1 = vector.load %arg4[%c0_1, %c0_2] : memref<18x18xf32, #tpu.memory_space<vmem>>, vector<18x18xf32>
    %cst = arith.constant dense<0.000000e+00> : vector<2x18xf32>
    %2 = tpu.matmul %0, %1, %cst {dimension_numbers = #tpu.dot_dimension_numbers<[1], [0], [0], [1], [0, 0, 1, 1], [], []>, precision = #tpu.contract_precision<fp32>} : vector<2x18xf32>, vector<18x18xf32>, vector<2x18xf32> -> vector<2x18xf32>
    %c0_3 = arith.constant 0 : index
    %c0_4 = arith.constant 0 : index
    %3 = vector.load %arg2[%c0_3, %c0_4] : memref<2x18xf32, #tpu.memory_space<vmem>>, vector<2x18xf32>
    %c0_5 = arith.constant 0 : index
    %c0_6 = arith.constant 0 : index
    %4 = vector.load %arg5[%c0_5, %c0_6] : memref<18x18xf32, #tpu.memory_space<vmem>>, vector<18x18xf32>
    %cst_7 = arith.constant dense<0.000000e+00> : vector<2x18xf32>
    %5 = tpu.matmul %3, %4, %cst_7 {dimension_numbers = #tpu.dot_dimension_numbers<[1], [0], [0], [1], [0, 0, 1, 1], [], []>, precision = #tpu.contract_precision<fp32>} : vector<2x18xf32>, vector<18x18xf32>, vector<2x18xf32> -> vector<2x18xf32>
    %6 = arith.addf %2, %5 : vector<2x18xf32>
    %c0_8 = arith.constant 0 : index
    %c0_9 = arith.constant 0 : index
    %7 = vector.load %arg3[%c0_8, %c0_9] : memref<2x12xf32, #tpu.memory_space<vmem>>, vector<2x12xf32>
    %c0_10 = arith.constant 0 : index
    %c0_11 = arith.constant 0 : index
    %8 = vector.load %arg6[%c0_10, %c0_11] : memref<12x18xf32, #tpu.memory_space<vmem>>, vector<12x18xf32>
    %cst_12 = arith.constant dense<0.000000e+00> : vector<2x18xf32>
    %9 = tpu.matmul %7, %8, %cst_12 {dimension_numbers = #tpu.dot_dimension_numbers<[1], [0], [0], [1], [0, 0, 1, 1], [], []>, precision = #tpu.contract_precision<fp32>} : vector<2x12xf32>, vector<12x18xf32>, vector<2x18xf32> -> vector<2x18xf32>
    %10 = arith.addf %6, %9 : vector<2x18xf32>
    %c0_13 = arith.constant 0 : index
    %c0_14 = arith.constant 0 : index
    %11 = vector.load %arg7[%c0_13, %c0_14] : memref<1x18xf32, #tpu.memory_space<vmem>>, vector<1x18xf32>
    %12 = vector.broadcast %11 : vector<1x18xf32> to vector<2x18xf32>
    %13 = arith.addf %10, %12 : vector<2x18xf32>
    %c0_15 = arith.constant 0 : index
    %c0_16 = arith.constant 0 : index
    %14 = vector.load %arg8[%c0_15, %c0_16] : memref<2x18xf32, #tpu.memory_space<vmem>>, vector<2x18xf32>
    tpu.vector_store %arg8[%c0_15, %c0_16], %13 {strides = array<i32>} : memref<2x18xf32, #tpu.memory_space<vmem>>, vector<2x18xf32>,
    return
  }
  func.func @transform_0(%arg0: i32) -> (i32, i32) {
    %c0_i32 = arith.constant 0 : i32
    %c0_i32_0 = arith.constant 0 : i32
    return %arg0, %c0_i32 : i32, i32
  }
  func.func @transform_1(%arg0: i32) -> (i32, i32) {
    %c0_i32 = arith.constant 0 : i32
    %c0_i32_0 = arith.constant 0 : i32
    return %arg0, %c0_i32 : i32, i32
  }
  func.func @transform_2(%arg0: i32) -> (i32, i32) {
    %c0_i32 = arith.constant 0 : i32
    %c0_i32_0 = arith.constant 0 : i32
    return %arg0, %c0_i32 : i32, i32
  }
  func.func @transform_3(%arg0: i32) -> (i32, i32) {
    %c0_i32 = arith.constant 0 : i32
    %c0_i32_0 = arith.constant 0 : i32
    %c0_i32_1 = arith.constant 0 : i32
    return %c0_i32, %c0_i32_0 : i32, i32
  }
  func.func @transform_4(%arg0: i32) -> (i32, i32) {
    %c0_i32 = arith.constant 0 : i32
    %c0_i32_0 = arith.constant 0 : i32
    %c0_i32_1 = arith.constant 0 : i32
    return %c0_i32, %c0_i32_0 : i32, i32
  }
  func.func @transform_5(%arg0: i32) -> (i32, i32) {
    %c0_i32 = arith.constant 0 : i32
    %c0_i32_0 = arith.constant 0 : i32
    %c0_i32_1 = arith.constant 0 : i32
    return %c0_i32, %c0_i32_0 : i32, i32
  }
  func.func @transform_6(%arg0: i32) -> (i32, i32) {
    %c0_i32 = arith.constant 0 : i32
    %c0_i32_0 = arith.constant 0 : i32
    %c0_i32_1 = arith.constant 0 : i32
    return %c0_i32, %c0_i32_0 : i32, i32
  }
  func.func @transform_7(%arg0: i32) -> (i32, i32) {
    %c0_i32 = arith.constant 0 : i32
    %c0_i32_0 = arith.constant 0 : i32
    return %arg0, %c0_i32 : i32, i32
  }
}

</mosaic_0001>

<bundles_post_ra>
// kernel: tpu_custom_call.1
= control target key start
LH: loop header
LB: loop body
LE: loop exit
PB: predicated region body
PF: predicated region fallthrough
CT: control target
= control target key end

     0   :  { %12 = vsyncpa [#allocation3], 0  ;;  %s2193_s0 = inlined_call_operand.hbm [shape: f32[2,18], index: 0, kind: input, shape index: {}]   ;;  %s2194_s1 = inlined_call_operand.hbm [shape: f32[2,18], index: 1, kind: input, shape index: {}]   ;;  %s2195_s2 = inlined_call_operand.vmem [shape: f32[2,12], index: 2, kind: input, shape index: {}]   ;;  %s2196_s3 = inlined_call_operand.hbm [shape: f32[18,18], index: 3, kind: input, shape index: {}]   ;;  %s2197_s4 = inlined_call_operand.hbm [shape: f32[18,18], index: 4, kind: input, shape index: {}]   ;;  %s2198_s5 = inlined_call_operand.hbm [shape: f32[12,18], index: 5, kind: input, shape index: {}]   ;;  %s2199_s6 = inlined_call_operand.vmem [shape: f32[1,18], index: 6, kind: input, shape index: {}]   ;;  %s2200_s7 = inlined_call_operand.hbm [shape: f32[2,18], index: 7, kind: output, shape index: {}]  }
   0x1   :  { %13 = vsyncpa [#allocation6], 0 }
   0x2   :  { %14 = vsyncpa [#allocation9], 0 }
   0x3   :  { %15 = vsyncpa [#allocation4], 0  ;;  %s1910_s24 = smov [#allocation5]  }
   0x4   :  { %s32_s25 = sshll.u32 %s1910_s24, 4  ;;  %s33_s25 = int_to_ptr.vmem [resolvable:$true] %s32_s25 }
   0x5   :  { %s1790_s26 = scalar_lea.vmem %s33_s25, 32  ;;  %p1795_p1 = scmp.lt.s32.totalorder %s33_s25, %s33_s25 }
   0x6   :  { %p1791_p0 = scmp.ne.s32.totalorder %s33_s25, %s1790_s26  ;;  %p1796_p2 = scmp.lt.s32.totalorder %s1790_s26, %s1790_s26 }
   0x8   :  { %p1797_p3 = por %p1796_p2, %p1795_p1 }
   0xa   :  { %p1798_p4 = pnand %p1797_p3, %p1791_p0 }
   0xc   :  { %1801 = shalt.err (!%p1798_p4)
}
   0xd   :  { %35 = dma.hbm_to_vmem [thread:$0]  %s2194_s1, 32, %s33_s25, [#allocation6]  }
   0xe   :  { %s1911_s29 = smov [#allocation8]   ;;  %s1912_s8 = smov [#allocation2]  }
   0xf   :  { %s55_s30 = sshll.u32 %s1911_s29, 4  ;;  %s22_s9 = sshll.u32 %s1912_s8, 4  ;;  %s56_s30 = int_to_ptr.vmem [resolvable:$true] %s55_s30  ;;  %s23_s9 = int_to_ptr.vmem [resolvable:$true] %s22_s9 }
  0x10   :  { %s1810_s10 = scalar_lea.vmem %s56_s30, 384  ;;  %p1815_p6 = scmp.lt.s32.totalorder %s56_s30, %s56_s30 }
  0x11   :  { %p1811_p5 = scmp.ne.s32.totalorder %s56_s30, %s1810_s10  ;;  %p1816_p7 = scmp.lt.s32.totalorder %s1810_s10, %s1810_s10 }
  0x13   :  { %p1817_p8 = por %p1816_p7, %p1815_p6 }
  0x15   :  { %p1818_p9 = pnand %p1817_p8, %p1811_p5 }
  0x17   :  { %1821 = shalt.err (!%p1818_p9)
}
  0x18   :  { %s1913_s11 = smov 128   ;;  %s1914_s12 = smov 8  }
  0x19   :  { %61 = dma.hbm_to_vmem [thread:$0]  %s2197_s4, 384, %s56_s30, [#allocation9], %s1913_s11, %s1913_s11, %s1914_s12  }
  0x1a   :  { %s1830_s1 = scalar_lea.vmem %s23_s9, 32  ;;  %p1835_p11 = scmp.lt.s32.totalorder %s23_s9, %s23_s9 }
  0x1b   :  { %p1831_p10 = scmp.ne.s32.totalorder %s23_s9, %s1830_s1  ;;  %p1836_p12 = scmp.lt.s32.totalorder %s1830_s1, %s1830_s1 }
  0x1d   :  { %p1837_p13 = por %p1836_p12, %p1835_p11 }
  0x1f   :  { %p1838_p0 = pnand %p1837_p13, %p1831_p10 }
  0x21   :  { %1841 = shalt.err (!%p1838_p0)
}
  0x22   :  { %25 = dma.hbm_to_vmem [thread:$0]  %s2193_s0, 32, %s23_s9, [#allocation3]  }
  0x23   :  { %s1915_s17 = smov [#allocation7]   ;;  %s1916_s19 = smov [#allocation10]  }
  0x24   :  { %s43_s18 = sshll.u32 %s1915_s17, 4  ;;  %s67_s20 = sshll.u32 %s1916_s19, 4  ;;  %s44_s18 = int_to_ptr.vmem [resolvable:$true] %s43_s18  ;;  %s68_s20 = int_to_ptr.vmem [resolvable:$true] %s67_s20 }
  0x25   :  { %s1850_s21 = scalar_lea.vmem %s44_s18, 384  ;;  %p1855_p2 = scmp.lt.s32.totalorder %s44_s18, %s44_s18 }
  0x26   :  { %p1851_p1 = scmp.ne.s32.totalorder %s44_s18, %s1850_s21  ;;  %p1856_p3 = scmp.lt.s32.totalorder %s1850_s21, %s1850_s21 }
  0x28   :  { %p1857_p4 = por %p1856_p3, %p1855_p2 }
  0x2a   :  { %p1858_p5 = pnand %p1857_p4, %p1851_p1 }
  0x2c   :  { %1861 = shalt.err (!%p1858_p5)
}
  0x2d   :  { %49 = dma.hbm_to_vmem [thread:$0]  %s2196_s3, 384, %s44_s18, [#allocation6], %s1913_s11, %s1913_s11, %s1914_s12  }
  0x2e   :  { %s1870_s0 = scalar_lea.vmem %s68_s20, 256  ;;  %p1875_p7 = scmp.lt.s32.totalorder %s68_s20, %s68_s20 }
  0x2f   :  { %p1871_p6 = scmp.ne.s32.totalorder %s68_s20, %s1870_s0  ;;  %p1876_p8 = scmp.lt.s32.totalorder %s1870_s0, %s1870_s0 }
  0x31   :  { %p1877_p9 = por %p1876_p8, %p1875_p7 }
  0x33   :  { %p1878_p10 = pnand %p1877_p9, %p1871_p6 }
  0x35   :  { %1881 = shalt.err (!%p1878_p10)
}
  0x36   :  { %73 = dma.hbm_to_vmem [thread:$0]  %s2198_s5, 256, %s68_s20, [#allocation9], %s1913_s11, %s1913_s11, %s1914_s12  }
  0x37   :  { %1902 = dma.done.wait [#allocation3], 32  }
  0x38   :  { %1903 = vsyncadd [#allocation3], 4294967264 }
  0x39   :  { %1904 = dma.done.wait [#allocation6], 416  }
  0x3a   :  { %1905 = vsyncadd [#allocation6], 4294966880 }
  0x3b   :  { %1906 = dma.done.wait [#allocation9], 640  }
  0x3c   :  { %1907 = vsyncadd [#allocation9], 4294966656  ;;  %v1917_v0 = vmov 0.0   ;;  %vm1918_vm0 = vmmov 0   ;;  %vm103_vm1 = vcmask 1041408   ;;  %v97_v2 = vld [vmem:[#allocation8 + $0x8] sm:$0xff] }
  0x3d   :  { %1622 = vmatprep.subr.mxu0 %v1917_v0  ;;  %1631 = vmatprep.subr.mxu1 %v1917_v0  ;;  %v98_v1 = vld [vmem:[#allocation8 + $0x10] sm:$0x3]  ;;  %v96_v3 = vld [vmem:[#allocation8] sm:$0xff]  ;;  %vm99_vm2 = vcmask 146432   ;;  %v1991_v5 = vand.u32 4294901760, %v97_v2  ;;  %v92_v34 = vld [vmem:[#allocation7] sm:$0xff] }
  0x3e   :  { %1628 = vmatprep.mubr.msk.f32.mxu0 %vm1918_vm0, %v1917_v0  ;;  %1637 = vmatprep.mubr.msk.f32.mxu1 %vm1918_vm0, %v1917_v0  ;;  %v105_v4 = vsel %vm103_vm1, %v98_v1, 0  ;;  %v1993_v6 = vand.u32 4294901760, %v96_v3  ;;  %v95_v8 = vld [vmem:[#allocation5] sm:$0x3]  ;;  %v91_v23 = vld [vmem:[#allocation2] sm:$0x3] }
  0x3f   :  { %v1995_v7 = vand.u32 4294901760, %v105_v4  ;;  %v101_v9 = vsel %vm99_vm2, %v95_v8, 0  ;;  %v1999_v10 = vsub.f32 %v97_v2, %v1991_v5  ;;  %v94_v26 = vld [vmem:[#allocation7 + $0x10] sm:$0x3]  ;;  %v580_v29 = vsel %vm99_vm2, %v91_v23, 0  ;;  %v93_v31 = vld [vmem:[#allocation7 + $0x8] sm:$0xff] }
  0x40   :  { %v2002_v11 = vsub.f32 %v96_v3, %v1993_v6  ;;  %v2006_v13 = vand.u32 4294901760, %v101_v9  ;;  %v583_v30 = vsel %vm103_vm1, %v94_v26, 0  ;;  %v2022_v32 = vand.u32 4294901760, %v580_v29  ;;  %v1059_v51 = vld [vmem:[#allocation10 + $0x8] sm:$0xf]  ;;  %v1058_v57 = vld [vmem:[#allocation10] sm:$0xff] }
  0x41   :  { %1623 = vmatpush3.msra.mxu0 %v1995_v7  ;;  %v213_v12 = vsub.f32 %v105_v4, %v1995_v7  ;;  %v221_v14 = vand.u32 4294901760, %v1999_v10  ;;  %v2025_v33 = vand.u32 4294901760, %v583_v30  ;;  %v2031_v35 = vand.u32 4294901760, %v93_v31  ;;  %v1057_v52 = vld [vmem:[%s2195_s2] sm:$0x3]  ;;  %s1919_s26 = smov [#allocation11]  }
  0x42   :  { %1624 = vmatprep.subr.mxu0 %v1917_v0  ;;  %v228_v15 = vand.u32 4294901760, %v2002_v11  ;;  %v176_v17 = vsub.f32 %v101_v9, %v2006_v13  ;;  %v2040_v37 = vand.u32 4294901760, %v92_v34  ;;  %v2043_v38 = vsub.f32 %v580_v29, %v2022_v32  ;;  %s1544_s27 = sshll.u32 %s1919_s26, 4  ;;  %s1545_s27 = int_to_ptr.vmem [resolvable:$true] %s1544_s27 }
  0x43   :  { %1625 = vmatpush3.msra.mxu0 %v1991_v5  ;;  %v214_v16 = vand.u32 4294901760, %v213_v12  ;;  %v222_v18 = vsub.f32 %v1999_v10, %v221_v14  ;;  %v2038_v36 = vsub.f32 %v583_v30, %v2025_v33  ;;  %v2049_v39 = vsub.f32 %v93_v31, %v2031_v35  ;;  %s1882_s28 = scalar_lea.vmem %s1545_s27, 32  ;;  %p1887_p12 = scmp.lt.s32.totalorder %s1545_s27, %s1545_s27 }
  0x44   :  { %1626 = vmatprep.subr.mxu0 %v1917_v0  ;;  %v177_v20 = vand.u32 4294901760, %v176_v17  ;;  %v229_v21 = vsub.f32 %v2002_v11, %v228_v15  ;;  %v2057_v40 = vsub.f32 %v92_v34, %v2040_v37  ;;  %v655_v42 = vand.u32 4294901760, %v2043_v38  ;;  %p1883_p11 = scmp.ne.s32.totalorder %s1545_s27, %s1882_s28  ;;  %p1888_p13 = scmp.lt.s32.totalorder %s1882_s28, %s1882_s28 }
  0x45   :  { %1627 = vmatpush3.msra.mxu0 %v1993_v6  ;;  %v215_v19 = vsub.f32 %v213_v12, %v214_v16  ;;  %v223_v25 = vand.u32 4294901760, %v222_v18  ;;  %v692_v41 = vand.u32 4294901760, %v2038_v36  ;;  %v699_v43 = vand.u32 4294901760, %v2049_v39 }
  0x46   :  { %1640 = vmatprep.subr.mxu0 %v1917_v0  ;;  %v178_v24 = vsub.f32 %v176_v17, %v177_v20  ;;  %v230_v28 = vand.u32 4294901760, %v229_v21  ;;  %v656_v45 = vsub.f32 %v2043_v38, %v655_v42  ;;  %v706_v46 = vand.u32 4294901760, %v2057_v40  ;;  %p1889_p0 = por %p1888_p13, %p1887_p12 }
  0x47   :  { %v216_v22 = vand.u32 4294901760, %v215_v19  ;;  %v693_v44 = vsub.f32 %v2038_v36, %v692_v41  ;;  %v700_v47 = vsub.f32 %v2049_v39, %v699_v43  ;;  %vm1064_vm3 = vcmask 1043456  }
  0x48   :  { %v179_v27 = vand.u32 4294901760, %v178_v24  ;;  %v657_v49 = vand.u32 4294901760, %v656_v45  ;;  %v707_v50 = vsub.f32 %v2057_v40, %v706_v46  ;;  %vm1060_vm4 = vcmask 97280   ;;  %p1890_p1 = pnand %p1889_p0, %p1883_p11 }
  0x49   :  { %1632 = vmatpush3.msra.mxu1 %v216_v22  ;;  %v694_v48 = vand.u32 4294901760, %v693_v44  ;;  %v701_v53 = vand.u32 4294901760, %v700_v47  ;;  %v1066_v55 = vsel %vm1064_vm3, %v1059_v51, 0  ;;  %v1062_v56 = vsel %vm1060_vm4, %v1057_v52, 0 }
  0x4a   :  { %1633 = vmatprep.subr.mxu1 %v1917_v0  ;;  %1629 = vmatmul.mubr.f32.vlgmr.msra.gmra.mxu0 %v179_v27  ;;  %v708_v54 = vand.u32 4294901760, %v707_v50  ;;  %v2105_v58 = vand.u32 4294901760, %v1066_v55  ;;  %v2107_v59 = vand.u32 4294901760, %v1062_v56  ;;  %v2113_v60 = vand.u32 4294901760, %v1058_v57 }
  0x4b   :  { %1634 = vmatpush3.msra.mxu1 %v223_v25  ;;  %1641 = vmatpush3.msra.mxu0 %v213_v12  ;;  %vm1536_vm5 = vcmask 140288  }
  0x4c   :  { %1635 = vmatprep.subr.mxu1 %v1917_v0  ;;  %1642 = vmatprep.subr.mxu0 %v1917_v0  ;;  %v1175_v61 = vsub.f32 %v1066_v55, %v2105_v58  ;;  %v1136_v62 = vsub.f32 %v1062_v56, %v2107_v59  ;;  %v1182_v63 = vsub.f32 %v1058_v57, %v2113_v60 }
  0x4d   :  { %1636 = vmatpush3.msra.mxu1 %v230_v28  ;;  %1643 = vmatpush3.msra.mxu0 %v1999_v10 }
  0x4e   :  { %1638 = vmatmul.mubr.f32.vlgmr.msra.gmra.mxu1 %v2006_v13  ;;  %1644 = vmatprep.subr.mxu0 %v1917_v0  ;;  %v1137_v1 = vand.u32 4294901760, %v1136_v62  ;;  %v1176_v2 = vand.u32 4294901760, %v1175_v61  ;;  %v1183_v3 = vand.u32 4294901760, %v1182_v63 }
  0x4f   :  { %1649 = vmatprep.subr.mxu1 %v1917_v0  ;;  %1645 = vmatpush3.msra.mxu0 %v2002_v11 }
  0x50   :  { %1646 = vmatprep.mubr.msk.f32.mxu0 %vm1918_vm0, %v1917_v0  ;;  %1650 = vmatpush3.msra.mxu1 %v1995_v7  ;;  %v1138_v4 = vsub.f32 %v1136_v62, %v1137_v1 }
  0x51   :  { %1647 = vmatmul.mubr.f32.vlgmr.msra.gmra.mxu0 %v176_v17  ;;  %1651 = vmatprep.subr.mxu1 %v1917_v0 }
  0x52   :  { %1658 = vmatprep.subr.mxu0 %v1917_v0  ;;  %1652 = vmatpush3.msra.mxu1 %v1991_v5 }
  0x53   :  { %1659 = vmatpush3.msra.mxu0 %v214_v16  ;;  %1653 = vmatprep.subr.mxu1 %v1917_v0 }
  0x54   :  { %1660 = vmatprep.subr.mxu0 %v1917_v0  ;;  %1654 = vmatpush3.msra.mxu1 %v1993_v6 }
  0x55   :  { %1655 = vmatprep.mubr.msk.f32.mxu1 %vm1918_vm0, %v1917_v0  ;;  %1661 = vmatpush3.msra.mxu0 %v221_v14 }
  0x56   :  { %1656 = vmatmul.mubr.f32.vlgmr.msra.gmra.mxu1 %v177_v20  ;;  %1662 = vmatprep.subr.mxu0 %v1917_v0 }
  0x57   :  { %1667 = vmatprep.subr.mxu1 %v1917_v0  ;;  %1663 = vmatpush3.msra.mxu0 %v228_v15 }
  0x58   :  { %1664 = vmatprep.mubr.msk.f32.mxu0 %vm1918_vm0, %v1917_v0  ;;  %1668 = vmatpush3.msra.mxu1 %v1995_v7  ;;  %v1139_v7 = vand.u32 4294901760, %v1138_v4 }
  0x59   :  { %1665 = vmatmul.mubr.f32.vlgmr.msra.gmra.mxu0 %v2006_v13  ;;  %1669 = vmatprep.subr.mxu1 %v1917_v0 }
  0x5a   :  { %1676 = vmatprep.subr.mxu0 %v1917_v0  ;;  %1670 = vmatpush3.msra.mxu1 %v1991_v5  ;;  %v1177_v5 = vsub.f32 %v1175_v61, %v1176_v2 }
  0x5b   :  { %1677 = vmatpush3.msra.mxu0 %v2025_v33  ;;  %1671 = vmatprep.subr.mxu1 %v1917_v0 }
  0x5c   :  { %1678 = vmatprep.subr.mxu0 %v1917_v0  ;;  %1672 = vmatpush3.msra.mxu1 %v1993_v6  ;;  %v1184_v6 = vsub.f32 %v1182_v63, %v1183_v3  ;;  %v1178_v8 = vand.u32 4294901760, %v1177_v5 }
  0x5d   :  { %1673 = vmatprep.mubr.msk.f32.mxu1 %vm1918_vm0, %v1917_v0  ;;  %1679 = vmatpush3.msra.mxu0 %v2031_v35 }
  0x5e   :  { %1674 = vmatmul.mubr.f32.vlgmr.msra.gmra.mxu1 %v2006_v13  ;;  %1680 = vmatprep.subr.mxu0 %v1917_v0  ;;  %v1185_v9 = vand.u32 4294901760, %v1184_v6 }
  0x5f   :  { %1685 = vmatprep.subr.mxu1 %v1917_v0  ;;  %1681 = vmatpush3.msra.mxu0 %v2040_v37 }
  0x60   :  { %1682 = vmatprep.mubr.msk.f32.mxu0 %vm1918_vm0, %v1917_v0  ;;  %1686 = vmatpush3.msra.mxu1 %v694_v48 }
  0x61   :  { %1683 = vmatmul.mubr.f32.vlgmr.msra.gmra.mxu0 %v657_v49  ;;  %1687 = vmatprep.subr.mxu1 %v1917_v0 }
  0x62   :  { %1694 = vmatprep.subr.mxu0 %v1917_v0  ;;  %1688 = vmatpush3.msra.mxu1 %v701_v53 }
  0x63   :  { %1695 = vmatpush3.msra.mxu0 %v2038_v36  ;;  %1689 = vmatprep.subr.mxu1 %v1917_v0 }
  0x64   :  { %1696 = vmatprep.subr.mxu0 %v1917_v0  ;;  %1690 = vmatpush3.msra.mxu1 %v708_v54 }
  0x65   :  { %1691 = vmatprep.mubr.msk.f32.mxu1 %vm1918_vm0, %v1917_v0  ;;  %1697 = vmatpush3.msra.mxu0 %v2049_v39 }
  0x66   :  { %1692 = vmatmul.mubr.f32.vlgmr.msra.gmra.mxu1 %v2022_v32  ;;  %1698 = vmatprep.subr.mxu0 %v1917_v0 }
  0x67   :  { %1703 = vmatprep.subr.mxu1 %v1917_v0  ;;  %1699 = vmatpush3.msra.mxu0 %v2057_v40 }
  0x68   :  { %1700 = vmatprep.mubr.msk.f32.mxu0 %vm1918_vm0, %v1917_v0  ;;  %1704 = vmatpush3.msra.mxu1 %v2025_v33 }
  0x69   :  { %1701 = vmatmul.mubr.f32.vlgmr.msra.gmra.mxu0 %v2043_v38  ;;  %1705 = vmatprep.subr.mxu1 %v1917_v0 }
  0x6a   :  { %1712 = vmatprep.subr.mxu0 %v1917_v0  ;;  %1706 = vmatpush3.msra.mxu1 %v2031_v35 }
  0x6b   :  { %1713 = vmatpush3.msra.mxu0 %v692_v41  ;;  %1707 = vmatprep.subr.mxu1 %v1917_v0 }
  0x6c   :  { %1714 = vmatprep.subr.mxu0 %v1917_v0  ;;  %1708 = vmatpush3.msra.mxu1 %v2040_v37 }
  0x6d   :  { %1709 = vmatprep.mubr.msk.f32.mxu1 %vm1918_vm0, %v1917_v0  ;;  %1715 = vmatpush3.msra.mxu0 %v699_v43 }
  0x6e   :  { %1710 = vmatmul.mubr.f32.vlgmr.msra.gmra.mxu1 %v655_v42  ;;  %1716 = vmatprep.subr.mxu0 %v1917_v0 }
  0x6f   :  { %1721 = vmatprep.subr.mxu1 %v1917_v0  ;;  %1717 = vmatpush3.msra.mxu0 %v706_v46 }
  0x70   :  { %1718 = vmatprep.mubr.msk.f32.mxu0 %vm1918_vm0, %v1917_v0  ;;  %1722 = vmatpush3.msra.mxu1 %v2025_v33 }
  0x71   :  { %1719 = vmatmul.mubr.f32.vlgmr.msra.gmra.mxu0 %v2022_v32  ;;  %1723 = vmatprep.subr.mxu1 %v1917_v0 }
  0x72   :  { %1730 = vmatprep.subr.mxu0 %v1917_v0  ;;  %1724 = vmatpush3.msra.mxu1 %v2031_v35 }
  0x73   :  { %1731 = vmatpush3.msra.mxu0 %v2105_v58  ;;  %1725 = vmatprep.subr.mxu1 %v1917_v0 }
  0x74   :  { %1727 = vmatprep.mubr.msk.f32.mxu1 %vm1918_vm0, %v1917_v0  ;;  %1726 = vmatpush3.msra.mxu1 %v2040_v37 }
  0x75   :  { %1732 = vmatprep.subr.mxu0 %v1917_v0  ;;  %1728 = vmatmul.mubr.f32.vlgmr.msra.gmra.mxu1 %v2022_v32 }
  0x76   :  { %1733 = vmatpush3.msra.mxu0 %v2113_v60  ;;  %1734 = vmatprep.mubr.msk.f32.mxu0 %vm1918_vm0, %v1917_v0 }
  0x77   :  { %1737 = vmatprep.subr.mxu1 %v1917_v0  ;;  %1735 = vmatmul.mubr.f32.vlgmr.msra.gmra.mxu0 %v1139_v7 }
  0x78   :  { %1738 = vmatpush3.msra.mxu1 %v1178_v8  ;;  %1744 = vmatprep.subr.mxu0 %v1917_v0 }
  0x79   :  { %1739 = vmatprep.subr.mxu1 %v1917_v0  ;;  %1745 = vmatpush3.msra.mxu0 %v1175_v61 }
  0x7a   :  { %1740 = vmatpush3.msra.mxu1 %v1185_v9  ;;  %1741 = vmatprep.mubr.msk.f32.mxu1 %vm1918_vm0, %v1917_v0 }
  0x7b   :  { %1746 = vmatprep.subr.mxu0 %v1917_v0  ;;  %1742 = vmatmul.mubr.f32.vlgmr.msra.gmra.mxu1 %v2107_v59 }
  0x7c   :  { %1747 = vmatpush3.msra.mxu0 %v1182_v63  ;;  %1748 = vmatprep.mubr.msk.f32.mxu0 %vm1918_vm0, %v1917_v0 }
  0x7d   :  { %1751 = vmatprep.subr.mxu1 %v1917_v0  ;;  %1749 = vmatmul.mubr.f32.vlgmr.msra.gmra.mxu0 %v1136_v62 }
  0x7e   :  { %1752 = vmatpush3.msra.mxu1 %v2105_v58  ;;  %1758 = vmatprep.subr.mxu0 %v1917_v0 }
  0x7f   :  { %1753 = vmatprep.subr.mxu1 %v1917_v0  ;;  %1759 = vmatpush3.msra.mxu0 %v1176_v2 }
  0x80   :  { %1754 = vmatpush3.msra.mxu1 %v2113_v60  ;;  %1755 = vmatprep.mubr.msk.f32.mxu1 %vm1918_vm0, %v1917_v0 }
  0x81   :  { %1760 = vmatprep.subr.mxu0 %v1917_v0  ;;  %1756 = vmatmul.mubr.f32.vlgmr.msra.gmra.mxu1 %v1137_v1 }
  0x82   :  { %1761 = vmatpush3.msra.mxu0 %v1183_v3  ;;  %1762 = vmatprep.mubr.msk.f32.mxu0 %vm1918_vm0, %v1917_v0 }
  0x83   :  { %1765 = vmatprep.subr.mxu1 %v1917_v0  ;;  %1763 = vmatmul.mubr.f32.vlgmr.msra.gmra.mxu0 %v2107_v59 }
  0x84   :  { %1766 = vmatpush3.msra.mxu1 %v2105_v58  ;;  %1769 = vmatprep.mubr.msk.f32.mxu1 %vm1918_vm0, %v1917_v0 }
  0x85   :  { %1767 = vmatprep.subr.mxu1 %v1917_v0 }
  0x86   :  { %1768 = vmatpush3.msra.mxu1 %v2113_v60  ;;  %v1555_v60 = vld [vmem:[%s2199_s6] ss:$0 sm:$0xff] }
  0x87   :  { %1770 = vmatmul.mubr.f32.vlgmr.msra.gmra.mxu1 %v2107_v59 }
 0x10a   :  { %v181_v10 = vpop.f32.mrf.mxu0 }
 0x10c   :  { %v1630_v11 = vpop.f32.mrf.mxu0 }
 0x10e   :  { %v267_v12 = vpop.f32.mrf.mxu1 }
 0x10f   :  { %v268_v26 = vadd.f32 %v267_v12, %v181_v10 }
 0x110   :  { %v1639_v13 = vpop.f32.mrf.mxu1 }
 0x111   :  { %v345_v14 = vpop.f32.mrf.mxu0 }
 0x112   :  { %v346_v28 = vadd.f32 %v345_v14, %v268_v26 }
 0x113   :  { %v1648_v15 = vpop.f32.mrf.mxu0 }
 0x116   :  { %v421_v16 = vpop.f32.mrf.mxu1 }
 0x117   :  { %v422_v30 = vadd.f32 %v421_v16, %v346_v28 }
 0x118   :  { %v1657_v17 = vpop.f32.mrf.mxu1 }
 0x119   :  { %v501_v18 = vpop.f32.mrf.mxu0 }
 0x11a   :  { %v502_v34 = vadd.f32 %v501_v18, %v422_v30 }
 0x11b   :  { %v1666_v19 = vpop.f32.mrf.mxu0 }
 0x11e   :  { %v575_v20 = vpop.f32.mrf.mxu1 }
 0x11f   :  { %v576_v35 = vadd.f32 %v575_v20, %v502_v34 }
 0x120   :  { %v1675_v21 = vpop.f32.mrf.mxu1 }
 0x121   :  { %v659_v22 = vpop.f32.mrf.mxu0 }
 0x122   :  { %v660_v39 = vadd.f32 %v659_v22, %v576_v35 }
 0x123   :  { %v1684_v23 = vpop.f32.mrf.mxu0 }
 0x126   :  { %v745_v24 = vpop.f32.mrf.mxu1 }
 0x127   :  { %v746_v41 = vadd.f32 %v745_v24, %v660_v39 }
 0x128   :  { %v1693_v0 = vpop.f32.mrf.mxu1 }
 0x129   :  { %v823_v25 = vpop.f32.mrf.mxu0 }
 0x12a   :  { %v824_v47 = vadd.f32 %v823_v25, %v746_v41 }
 0x12b   :  { %v1702_v27 = vpop.f32.mrf.mxu0 }
 0x12e   :  { %v899_v29 = vpop.f32.mrf.mxu1 }
 0x12f   :  { %v900_v49 = vadd.f32 %v899_v29, %v824_v47 }
 0x130   :  { %v1711_v31 = vpop.f32.mrf.mxu1 }
 0x131   :  { %v979_v32 = vpop.f32.mrf.mxu0 }
 0x132   :  { %v980_v55 = vadd.f32 %v979_v32, %v900_v49 }
 0x133   :  { %v1720_v33 = vpop.f32.mrf.mxu0 }
 0x135   :  { %v1053_v36 = vpop.f32.mrf.mxu1 }
 0x136   :  { %v1054_v58 = vadd.f32 %v1053_v36, %v980_v55 }
 0x137   :  { %v1141_v37 = vpop.f32.mrf.mxu0  ;;  %v1729_v38 = vpop.f32.mrf.mxu1 }
 0x139   :  { %v1736_v40 = vpop.f32.mrf.mxu0 }
 0x13b   :  { %v1222_v42 = vpop.f32.mrf.mxu1 }
 0x13c   :  { %v1223_v43 = vadd.f32 %v1222_v42, %v1141_v37 }
 0x13d   :  { %v1298_v44 = vpop.f32.mrf.mxu0  ;;  %v1743_v45 = vpop.f32.mrf.mxu1 }
 0x13e   :  { %v1299_v46 = vadd.f32 %v1298_v44, %v1223_v43 }
 0x13f   :  { %v1750_v48 = vpop.f32.mrf.mxu0 }
 0x141   :  { %v1373_v50 = vpop.f32.mrf.mxu1 }
 0x142   :  { %v1374_v51 = vadd.f32 %v1373_v50, %v1299_v46 }
 0x143   :  { %v1450_v52 = vpop.f32.mrf.mxu0  ;;  %v1757_v53 = vpop.f32.mrf.mxu1 }
 0x144   :  { %v1451_v54 = vadd.f32 %v1450_v52, %v1374_v51 }
 0x145   :  { %v1764_v56 = vpop.f32.mrf.mxu0 }
 0x147   :  { %v1523_v57 = vpop.f32.mrf.mxu1 }
 0x148   :  { %v1524_v59 = vadd.f32 %v1523_v57, %v1451_v54 }
 0x149   :  { %v1771_v61 = vpop.f32.mrf.mxu1 }
 0x14a   :  { %v1527_v62 = vadd.f32 %v1524_v59, %v1054_v58 }
 0x14c   :  { %v1535_v63 = vadd.f32 %v1555_v60, %v1527_v62 }
 0x14e   :  { %1537 = vst.msk [vmem:[#allocation11] sm:$0x3] %vm1536_vm5, %v1535_v63 }
 0x14f   :  { %1893 = shalt.err (!%p1890_p1)
}
 0x150   :  { %1547 = dma.vmem_to_hbm [thread:$0]  %s1545_s27, 32, %s2200_s7, [#allocation4]  }
 0x151   :  { %1908 = dma.done.wait [#allocation4], 32  }
 0x152   :  { %1909 = vsyncadd [#allocation4], 4294967264 }
 0x153   :  { %1551 = vsyncpa [#allocation3], 1 }
 0x154   :  { %1552 = vsyncpa [#allocation6], 1 }
 0x155   :  { %1553 = vsyncpa [#allocation9], 1 }
 0x156   :  { %1554 = vsyncpa [#allocation4], 1 }

</bundles_post_ra>
